<compile_context>
chip_gen: v5e
topology: v5e:2x2
jax: 0.10.0
libtpu: 0.0.40
codegen_flags: <defaults>
</compile_context>

<pallas_src>
import functools

import numpy as np
import jax
import jax.numpy as jnp
from jax.experimental import pallas as pl
from jax.experimental.pallas import tpu as pltpu

# Full-precision f32 matmuls everywhere so the in-kernel MXU dots and the
# pure-JAX reference round the same way (the TPU default may reduce precision).
jax.config.update("jax_default_matmul_precision", "float32")

EPSILON = float(np.finfo(np.float32).eps)

LANE = 128     # last-dim tile (vreg lanes)
SUBLANE = 8    # second-to-last-dim tile (vreg sublanes, f32)


def _round_up(n: int, m: int) -> int:
    return ((n + m - 1) // m) * m


def _pad2d(a, rows: int, cols: int):
    r, c = a.shape
    if (r, c) == (rows, cols):
        return a
    return jnp.pad(a, ((0, rows - r), (0, cols - c)))


def _nbytes(a) -> int:
    return int(a.size) * a.dtype.itemsize


# ---------------------------------------------------------------------------
# Feature probe: pl.reciprocal(approx=True) is the TPU EUP fast path; some
# interpreters/backends may not implement it.  Probe once, fall back to exact
# division, so the kernel always runs cleanly.
# ---------------------------------------------------------------------------
@functools.lru_cache(maxsize=None)
def _approx_reciprocal_supported() -> bool:
    def probe(x_ref, o_ref):
        d = x_ref[...]
        r = pl.reciprocal(d, approx=True)
        o_ref[...] = r * (2.0 - d * r)          # one Newton step

    try:
        x = jnp.full((SUBLANE, LANE), 2.0, jnp.float32)
        out = pl.pallas_call(
            probe, out_shape=jax.ShapeDtypeStruct((SUBLANE, LANE), jnp.float32)
        )(x)
        out = np.asarray(jax.block_until_ready(out))
        return bool(np.allclose(out, 0.5, rtol=1e-3, atol=1e-3))
    except Exception:  # noqa: BLE001 - any failure -> use exact division
        return False


# ---------------------------------------------------------------------------
# Parameter preparation (run ONCE, outside the hot loop).
# ---------------------------------------------------------------------------
def prepare_params(w1, w2, *, dtype=jnp.float32):
    """Transpose + zero-pad one layer's weights to lane-aligned shapes.

    w1: (comp, comp)     -> (comp_p, comp_p)
    w2: (comp, features) -> (feat_p, comp_p)
    """
    comp = w1.shape[0]
    features = w2.shape[1]
    comp_p = _round_up(comp, LANE)
    feat_p = _round_up(features, LANE)
    w1t = _pad2d(jnp.transpose(w1).astype(dtype), comp_p, comp_p)
    w2t = _pad2d(jnp.transpose(w2).astype(dtype), feat_p, comp_p)
    return w1t, w2t


def prepare_stack_params(w1_list, w2_list, *, dtype=jnp.float32):
    """Prepare an L-layer stack for the fused kernel.

    Returns:
      w1t_stack: (L, comp_p, comp_p)  per-layer fc1 weights (transposed, padded)
      w2t_wide : (feat_p, L*comp_p)   all fc2 weights side by side, so the L
                 layer-independent numerator matmuls become ONE wide MXU matmul.
    """
    # TODO(synk): cast weights to bf16 here (keeping f32 accumulation) once
    # comp/features are large enough to be MXU-bound; irrelevant at toy sizes.
    prepared = [prepare_params(w1, w2, dtype=dtype) for w1, w2 in zip(w1_list, w2_list)]
    w1t_stack = jnp.stack([p[0] for p in prepared], axis=0)
    w2t_wide = jnp.concatenate([p[1] for p in prepared], axis=1)
    return w1t_stack, w2t_wide


# ---------------------------------------------------------------------------
# Kernel
# ---------------------------------------------------------------------------
def _make_kernel(n_layers: int, comp_p: int, l_1: float, l_2: float, div_mode: str):
    l_1 = float(l_1)
    l_2 = float(l_2)
    const = l_1 + EPSILON

    def kernel(y_ref, x_ref, w1t_ref, w2t_ref, o_ref):
        # ONE wide MXU matmul: every layer's numerator (it never depends on y).
        num_all = jnp.dot(x_ref[...], w2t_ref[...],
                          preferred_element_type=jnp.float32)
        y = y_ref[...].astype(jnp.float32)
        # Static trip count -> unrolled; only the small y @ W1^T matmuls remain
        # on the serial y->y dependency chain.
        # TODO(synk): for deep stacks with large weights, turn the layer axis
        # into an "arbitrary" grid dimension (stream w1t/w2t per layer, keep y
        # in a VMEM accumulator) so the resident stack fits v7x's 64 MiB VMEM.
        for i in range(n_layers):
            numerator = num_all[:, i * comp_p:(i + 1) * comp_p]  # 128-aligned static slice
            fc1_y = jnp.dot(y, w1t_ref[i], preferred_element_type=jnp.float32)
            denom = fc1_y + l_2 * y + const
            if div_mode == "approx_newton":
                r = pl.reciprocal(denom, approx=True)   # EUP slot, off the VALU path
                r = r * (2.0 - denom * r)               # one Newton step -> ~f32 accuracy
                delta = numerator * r
            else:                                       # "exact": bit-parity debug path
                delta = numerator / denom
            y = delta * y
        o_ref[...] = y.astype(o_ref.dtype)

    return kernel


# ---------------------------------------------------------------------------
# Wrappers
# ---------------------------------------------------------------------------
def unsuper_stack_apply_padded(y_p, x_p, w1t_stack, w2t_wide, l_1, l_2,
                               *, div_mode="approx_newton"):
    """Fused L-layer UnsuperLayer stack in ONE pallas_call, padded layout.

    y_p: (batch_p, comp_p), x_p: (batch_p, feat_p) with batch_p % 8 == 0 and
    comp_p, feat_p % 128 == 0.  Padded lanes/rows stay exactly zero, so keep y
    in this layout between calls and slice back to (batch, comp) once at the end.
    """
    batch_p, comp_p = y_p.shape
    n_layers = w1t_stack.shape[0]
    feat_p, wide = w2t_wide.shape
    assert batch_p % SUBLANE == 0 and comp_p % LANE == 0 and feat_p % LANE == 0
    assert x_p.shape == (batch_p, feat_p)
    assert w1t_stack.shape == (n_layers, comp_p, comp_p)
    assert wide == n_layers * comp_p

    if div_mode == "approx_newton" and not _approx_reciprocal_supported():
        div_mode = "exact"

    kernel = _make_kernel(n_layers, comp_p, l_1, l_2, div_mode)
    operands = (y_p, x_p, w1t_stack, w2t_wide)

    # Whole-array VMEM residency, made explicit; raise the scoped-VMEM limit
    # past the 16/32 MiB defaults (capped v7x-safe at 64 MiB).
    vmem_bytes = sum(_nbytes(a) for a in operands) + _nbytes(y_p)
    vmem_limit = int(min(64 * 1024 * 1024,
                         max(16 * 1024 * 1024, 2 * vmem_bytes + (4 << 20))))
    vmem_spec = pl.BlockSpec(memory_space=pltpu.MemorySpace.VMEM)

    flops = 2 * batch_p * n_layers * comp_p * (feat_p + comp_p)
    transcendentals = n_layers * batch_p * comp_p if div_mode == "approx_newton" else 0
    bytes_accessed = sum(_nbytes(a) for a in operands) + _nbytes(y_p)

    # TODO(synk): when batch grows, add a leading batch-tile grid axis marked
    # "parallel" (shards across v7x's two TensorCores, bounds per-step VMEM).
    # TODO(synk): under jit with a donated padded-y buffer, add
    # input_output_aliases={0: 0} so the in-place multiplicative update reuses
    # the y buffer instead of allocating a new HBM output.
    return pl.pallas_call(
        kernel,
        out_shape=jax.ShapeDtypeStruct((batch_p, comp_p), y_p.dtype),
        in_specs=[vmem_spec] * len(operands),
        out_specs=vmem_spec,
        compiler_params=pltpu.CompilerParams(vmem_limit_bytes=vmem_limit),
        cost_estimate=pl.CostEstimate(
            flops=int(flops),
            transcendentals=int(transcendentals),
            bytes_accessed=int(bytes_accessed),
        ),
    )(*operands)


def pad_activations(y, x, comp_p, feat_p):
    """Zero-pad activations to the kernel's padded layout (do once per problem)."""
    batch = y.shape[0]
    batch_p = _round_up(batch, SUBLANE)
    return _pad2d(y, batch_p, comp_p), _pad2d(x, batch_p, feat_p)


def unsuper_stack_apply(y, x, w1t_stack, w2t_wide, l_1, l_2, **kwargs):
    """Convenience wrapper: pads, runs the fused stack, slices back."""
    batch, comp = y.shape
    comp_p = w1t_stack.shape[1]
    feat_p = w2t_wide.shape[0]
    y_p, x_p = pad_activations(y, x, comp_p, feat_p)
    out_p = unsuper_stack_apply_padded(y_p, x_p, w1t_stack, w2t_wide, l_1, l_2, **kwargs)
    return out_p[:batch, :comp]


def unsuper_layer_apply(y, x, w1t_p, w2t_p, l_1, l_2, **kwargs):
    """Single UnsuperLayer forward using pre-prepared (transposed, padded) weights."""
    return unsuper_stack_apply(y, x, w1t_p[None], w2t_p, l_1, l_2, **kwargs)


def unsuper_layer(y, x, w1, w2, l_1, l_2, **kwargs):
    """Drop-in equivalent of UnsuperLayer.forward (prepares weights internally)."""
    w1t_p, w2t_p = prepare_params(w1, w2)
    return unsuper_layer_apply(y, x, w1t_p, w2t_p, l_1, l_2, **kwargs)


# ---------------------------------------------------------------------------
# Pure-JAX references
# ---------------------------------------------------------------------------
def unsuper_layer_ref(y, x, w1, w2, l_1, l_2):
    denominator = (jnp.dot(y, w1.T, preferred_element_type=jnp.float32)
                   + l_2 * y + l_1 + EPSILON)
    numerator = jnp.dot(x, w2.T, preferred_element_type=jnp.float32)
    return (numerator / denominator) * y


def unsuper_stack_ref(y, x, w1_list, w2_list, l_1, l_2):
    for w1, w2 in zip(w1_list, w2_list):
        y = unsuper_layer_ref(y, x, w1, w2, l_1, l_2)
    return y


if __name__ == "__main__":
    # Shapes consistent with the module: batch=8, comp=32, features=64.
    batch, comp, features = 8, 32, 64
    n_layers = 4
    l_1, l_2 = 0.1, 0.05

    key = jax.random.PRNGKey(0)
    k_y, k_x, k_w = jax.random.split(key, 3)

    # NMF regime: nonnegative activations AND nonnegative weights (Deep-NMF
    # constrains W >= 0), so every denominator is >= l_1 + EPS and the chained
    # multiplicative updates are well conditioned (the previous signed-weight
    # stack test amplified ulp-level rounding differences chaotically).
    y = jax.random.uniform(k_y, (batch, comp), dtype=jnp.float32)
    x = jax.random.uniform(k_x, (batch, features), dtype=jnp.float32)

    b1 = 1.0 / np.sqrt(comp)
    b2 = 1.0 / np.sqrt(features)
    w_keys = jax.random.split(k_w, 2 * n_layers)
    w1_list = [jax.random.uniform(w_keys[2 * i], (comp, comp), jnp.float32, 0.0, b1)
               for i in range(n_layers)]
    w2_list = [jax.random.uniform(w_keys[2 * i + 1], (comp, features), jnp.float32, 0.0, b2)
               for i in range(n_layers)]

    # --- single layer, exact-division parity mode ----------------------------
    ref1 = unsuper_layer_ref(y, x, w1_list[0], w2_list[0], l_1, l_2)
    out1 = jax.block_until_ready(
        unsuper_layer(y, x, w1_list[0], w2_list[0], l_1, l_2, div_mode="exact"))
    np.testing.assert_allclose(np.asarray(out1), np.asarray(ref1), rtol=1e-5, atol=1e-6)

    # --- single layer, default fast path (EUP reciprocal + Newton step) ------
    out1_fast = jax.block_until_ready(
        unsuper_layer(y, x, w1_list[0], w2_list[0], l_1, l_2))
    np.testing.assert_allclose(np.asarray(out1_fast), np.asarray(ref1), rtol=1e-4, atol=1e-6)

    # --- fused 4-layer stack, padded layout (pad once / slice once) ----------
    w1t_stack, w2t_wide = prepare_stack_params(w1_list, w2_list)          # ONCE
    comp_p, feat_p = w1t_stack.shape[1], w2t_wide.shape[0]
    y_p, x_p = pad_activations(y, x, comp_p, feat_p)                      # ONCE
    out_p = jax.block_until_ready(
        unsuper_stack_apply_padded(y_p, x_p, w1t_stack, w2t_wide, l_1, l_2))
    out_stack = np.asarray(out_p)[:batch, :comp]                          # slice ONCE
    ref_stack = np.asarray(unsuper_stack_ref(y, x, w1_list, w2_list, l_1, l_2))
    np.testing.assert_allclose(out_stack, ref_stack, rtol=1e-4, atol=1e-6)

    print("KERNEL_OK")
</pallas_src>

<mosaic_0001>
module attributes {stable_mosaic.version = 11 : i64} {
  func.func @kernel(%arg0: memref<8x128xf32, #tpu.memory_space<vmem>>, %arg1: memref<8x128xf32, #tpu.memory_space<vmem>>, %arg2: memref<1x128x128xf32, #tpu.memory_space<vmem>>, %arg3: memref<128x128xf32, #tpu.memory_space<vmem>>, %arg4: memref<8x128xf32, #tpu.memory_space<vmem>>) attributes {dimension_semantics = [], scalar_prefetch = 0 : i64, scratch_operands = 0 : i64, tpu.core_type = #tpu.core_type<tc>} {
    %c0 = arith.constant 0 : index
    %c0_0 = arith.constant 0 : index
    %0 = vector.load %arg1[%c0, %c0_0] : memref<8x128xf32, #tpu.memory_space<vmem>>, vector<8x128xf32>
    %c0_1 = arith.constant 0 : index
    %c0_2 = arith.constant 0 : index
    %1 = vector.load %arg3[%c0_1, %c0_2] : memref<128x128xf32, #tpu.memory_space<vmem>>, vector<128x128xf32>
    %cst = arith.constant dense<0.000000e+00> : vector<8x128xf32>
    %2 = tpu.matmul %0, %1, %cst {dimension_numbers = #tpu.dot_dimension_numbers<[1], [0], [0], [1], [0, 0, 1, 1], [], []>, precision = #tpu.contract_precision<fp32>} : vector<8x128xf32>, vector<128x128xf32>, vector<8x128xf32> -> vector<8x128xf32>
    %c0_3 = arith.constant 0 : index
    %c0_4 = arith.constant 0 : index
    %3 = vector.load %arg0[%c0_3, %c0_4] : memref<8x128xf32, #tpu.memory_space<vmem>>, vector<8x128xf32>
    %c0_5 = arith.constant 0 : index
    %c0_6 = arith.constant 0 : index
    %c0_7 = arith.constant 0 : index
    %4 = vector.load %arg2[%c0_5, %c0_6, %c0_7] : memref<1x128x128xf32, #tpu.memory_space<vmem>>, vector<1x128x128xf32>
    %5 = vector.shape_cast %4 : vector<1x128x128xf32> to vector<128x128xf32>
    %cst_8 = arith.constant dense<0.000000e+00> : vector<8x128xf32>
    %6 = tpu.matmul %3, %5, %cst_8 {dimension_numbers = #tpu.dot_dimension_numbers<[1], [0], [0], [1], [0, 0, 1, 1], [], []>, precision = #tpu.contract_precision<fp32>} : vector<8x128xf32>, vector<128x128xf32>, vector<8x128xf32> -> vector<8x128xf32>
    %cst_9 = arith.constant 5.000000e-02 : f32
    %7 = vector.broadcast %cst_9 : f32 to vector<8x128xf32>
    %8 = arith.mulf %7, %3 : vector<8x128xf32>
    %9 = arith.addf %6, %8 : vector<8x128xf32>
    %cst_10 = arith.constant 0.100000121 : f32
    %10 = vector.broadcast %cst_10 : f32 to vector<8x128xf32>
    %11 = arith.addf %9, %10 : vector<8x128xf32>
    %12 = arith.divf %2, %11 : vector<8x128xf32>
    %13 = arith.mulf %12, %3 : vector<8x128xf32>
    %c0_11 = arith.constant 0 : index
    %c0_12 = arith.constant 0 : index
    %14 = vector.load %arg4[%c0_11, %c0_12] : memref<8x128xf32, #tpu.memory_space<vmem>>, vector<8x128xf32>
    tpu.vector_store %arg4[%c0_11, %c0_12], %13 {strides = array<i32>} : memref<8x128xf32, #tpu.memory_space<vmem>>, vector<8x128xf32>,
    return
  }
}

</mosaic_0001>

<bundles_post_ra>
// kernel: tpu_custom_call.1
= control target key start
LH: loop header
LB: loop body
LE: loop exit
PB: predicated region body
PF: predicated region fallthrough
CT: control target
= control target key end

     0   :  { %9 = vsyncpa [#allocation3], 0  ;;  %s1513_s0 = inlined_call_operand.hbm [shape: f32[8,128], index: 0, kind: input, shape index: {}]   ;;  %s1514_s1 = inlined_call_operand.hbm [shape: f32[8,128], index: 1, kind: input, shape index: {}]   ;;  %s1515_s2 = inlined_call_operand.hbm [shape: f32[1,128,128], index: 2, kind: input, shape index: {}]   ;;  %s1516_s3 = inlined_call_operand.hbm [shape: f32[128,128], index: 3, kind: input, shape index: {}]   ;;  %s1517_s4 = inlined_call_operand.hbm [shape: f32[8,128], index: 4, kind: output, shape index: {}]  }
   0x1   :  { %10 = vsyncpa [#allocation6], 0 }
   0x2   :  { %11 = vsyncpa [#allocation9], 0  ;;  %s29_s17 = sshll.u32 %s1514_s1, 4  ;;  %s30_s17 = int_to_ptr.hbm [resolvable:$true] %s29_s17 }
   0x3   :  { %12 = vsyncpa [#allocation4], 0  ;;  %s968_s18 = smov [#allocation5]   ;;  %s18_s22 = sshll.u32 %s1513_s0, 4  ;;  %s19_s22 = int_to_ptr.hbm [resolvable:$true] %s18_s22 }
   0x4   :  { %s31_s19 = sshll.u32 %s968_s18, 4  ;;  %s969_s23 = smov [#allocation2]   ;;  %s32_s19 = int_to_ptr.vmem [resolvable:$true] %s31_s19 }
   0x5   :  { %34 = dma.hbm_to_vmem [thread:$0]  %s30_s17, 128, %s32_s19, [#allocation6]  }
   0x6   :  { %s20_s24 = sshll.u32 %s969_s23, 4  ;;  %s39_s27 = sshll.u32 %s1515_s2, 4  ;;  %s21_s24 = int_to_ptr.vmem [resolvable:$true] %s20_s24  ;;  %s40_s27 = int_to_ptr.hbm [resolvable:$true] %s39_s27 }
   0x7   :  { %23 = dma.hbm_to_vmem [thread:$0]  %s19_s22, 128, %s21_s24, [#allocation3]  }
   0x8   :  { %s970_s1 = smov [#allocation7]   ;;  %s52_s5 = sshll.u32 %s1516_s3, 4  ;;  %s53_s5 = int_to_ptr.hbm [resolvable:$true] %s52_s5 }
   0x9   :  { %s41_s28 = sshll.u32 %s970_s1, 4  ;;  %s971_s6 = smov 128   ;;  %s42_s28 = int_to_ptr.vmem [resolvable:$true] %s41_s28 }
   0xa   :  { %s972_s0 = smov 8   ;;  %s973_s7 = smov [#allocation8]  }
   0xb   :  { %47 = dma.hbm_to_vmem [thread:$0]  %s40_s27, 2048, %s42_s28, [#allocation6], %s971_s6, %s971_s6, %s972_s0  }
   0xc   :  { %s54_s8 = sshll.u32 %s973_s7, 4  ;;  %s55_s8 = int_to_ptr.vmem [resolvable:$true] %s54_s8 }
   0xd   :  { %60 = dma.hbm_to_vmem [thread:$0]  %s53_s5, 2048, %s55_s8, [#allocation9], %s971_s6, %s971_s6, %s972_s0  }
   0xe   :  { %960 = dma.done.wait [#allocation3], 128  }
   0xf   :  { %961 = vsyncadd [#allocation3], 4294967168 }
  0x10   :  { %962 = dma.done.wait [#allocation6], 2176  }
  0x11   :  { %963 = vsyncadd [#allocation6], 4294965120 }
  0x12   :  { %964 = dma.done.wait [#allocation9], 2048  }
  0x13   :  { %965 = vsyncadd [#allocation9], 4294965248  ;;  %v93_v0 = vld [vmem:[#allocation8 + $0x78] sm:$0xff]  ;;  %v92_v1 = vld [vmem:[#allocation8 + $0x70] sm:$0xff]  ;;  %s974_s2 = smov [#allocation10]   ;;  %s819_s11 = sshll.u32 %s1517_s4, 4  ;;  %s820_s11 = int_to_ptr.hbm [resolvable:$true] %s819_s11 }
  0x14   :  { %v91_v2 = vld [vmem:[#allocation8 + $0x68] sm:$0xff]  ;;  %v1012_v3 = vand.u32 4294901760, %v93_v0  ;;  %v1014_v4 = vand.u32 4294901760, %v92_v1  ;;  %v90_v6 = vld [vmem:[#allocation8 + $0x60] sm:$0xff]  ;;  %v89_v7 = vld [vmem:[#allocation8 + $0x58] sm:$0xff]  ;;  %s817_s3 = sshll.u32 %s974_s2, 4  ;;  %s818_s3 = int_to_ptr.vmem [resolvable:$true] %s817_s3 }
  0x15   :  { %v1016_v5 = vand.u32 4294901760, %v91_v2  ;;  %v88_v8 = vld [vmem:[#allocation8 + $0x50] sm:$0xff]  ;;  %v1018_v9 = vand.u32 4294901760, %v90_v6  ;;  %v1020_v10 = vand.u32 4294901760, %v89_v7  ;;  %v87_v12 = vld [vmem:[#allocation8 + $0x48] sm:$0xff]  ;;  %v86_v13 = vld [vmem:[#allocation8 + $0x40] sm:$0xff] }
  0x16   :  { %v1022_v11 = vand.u32 4294901760, %v88_v8  ;;  %v1025_v14 = vsub.f32 %v93_v0, %v1012_v3  ;;  %95 = vmatpush.msra.mxu0 %v1012_v3  ;;  %v1029_v15 = vsub.f32 %v92_v1, %v1014_v4  ;;  %291 = vmatpush.msra.mxu3 %v1012_v3  ;;  %v1035_v17 = vand.u32 4294901760, %v87_v12  ;;  %v85_v25 = vld [vmem:[#allocation8 + $0x38] sm:$0xff]  ;;  %v84_v34 = vld [vmem:[#allocation8 + $0x30] sm:$0xff]  ;;  %v83_v35 = vld [vmem:[#allocation8 + $0x28] sm:$0xff] }
  0x17   :  { %v1033_v16 = vsub.f32 %v91_v2, %v1016_v5  ;;  %v1038_v18 = vsub.f32 %v90_v6, %v1018_v9  ;;  %v1041_v19 = vsub.f32 %v89_v7, %v1020_v10  ;;  %v1043_v20 = vand.u32 4294901760, %v86_v13  ;;  %v82_v42 = vld [vmem:[#allocation8 + $0x20] sm:$0xff]  ;;  %v81_v47 = vld [vmem:[#allocation8 + $0x18] sm:$0xff]  ;;  %v80_v53 = vld [vmem:[#allocation8 + $0x10] sm:$0xff] }
  0x18   :  { %238 = vmatpush.msra.mxu2 %v1025_v14  ;;  %97 = vmatpush.msra.mxu0 %v1014_v4  ;;  %v1532_v21 = vand.u32 4294901760, %v1025_v14  ;;  %v1531_v22 = vand.u32 4294901760, %v1029_v15  ;;  %v1051_v24 = vsub.f32 %v88_v8, %v1022_v11  ;;  %v1057_v28 = vsub.f32 %v87_v12, %v1035_v17  ;;  %v79_v59 = vld [vmem:[#allocation8 + $0x8] sm:$0xff]  ;;  %v451_v60 = vld [vmem:[#allocation7 + $0x78] sm:$0xff]  ;;  %v450_v63 = vld [vmem:[#allocation7 + $0x70] sm:$0xff] }
  0x19   :  { %v1529_v23 = vand.u32 4294901760, %v1033_v16  ;;  %293 = vmatpush.msra.mxu3 %v1014_v4  ;;  %v1527_v26 = vand.u32 4294901760, %v1038_v18  ;;  %v1526_v27 = vand.u32 4294901760, %v1041_v19  ;;  %v1072_v32 = vsub.f32 %v86_v13, %v1043_v20  ;;  %v78_v6 = vld [vmem:[#allocation8] sm:$0xff]  ;;  %v449_v13 = vld [vmem:[#allocation7 + $0x68] sm:$0xff] }
  0x1a   :  { %241 = vmatpush.msra.mxu2 %v1029_v15  ;;  %v138_v29 = vsub.f32 %v1025_v14, %v1532_v21  ;;  %99 = vmatpush.msra.mxu0 %v1016_v5  ;;  %v144_v30 = vsub.f32 %v1029_v15, %v1531_v22  ;;  %v1074_v33 = vand.u32 4294901760, %v85_v25  ;;  %v1525_v39 = vand.u32 4294901760, %v1051_v24  ;;  %v442_v22 = vld [vmem:[#allocation7 + $0x30] sm:$0xff] }
  0x1b   :  { %v150_v31 = vsub.f32 %v1033_v16, %v1529_v23  ;;  %295 = vmatpush.msra.mxu3 %v1016_v5  ;;  %v156_v38 = vsub.f32 %v1038_v18, %v1527_v26  ;;  %v162_v40 = vsub.f32 %v1041_v19, %v1526_v27  ;;  %v1523_v41 = vand.u32 4294901760, %v1057_v28 }
  0x1c   :  { %v139_v36 = vand.u32 4294901760, %v138_v29  ;;  %244 = vmatpush.msra.mxu2 %v1033_v16  ;;  %v145_v37 = vand.u32 4294901760, %v144_v30  ;;  %101 = vmatpush.msra.mxu0 %v1018_v9  ;;  %v1089_v44 = vsub.f32 %v85_v25, %v1074_v33  ;;  %v1091_v45 = vand.u32 4294901760, %v84_v34 }
  0x1d   :  { %297 = vmatpush.msra.mxu3 %v1018_v9  ;;  %v151_v43 = vand.u32 4294901760, %v150_v31  ;;  %v1093_v46 = vand.u32 4294901760, %v83_v35  ;;  %v1522_v48 = vand.u32 4294901760, %v1072_v32  ;;  %v157_v49 = vand.u32 4294901760, %v156_v38 }
  0x1e   :  { %140 = vmatpush.msra.mxu1 %v139_v36  ;;  %247 = vmatpush.msra.mxu2 %v1038_v18  ;;  %v168_v50 = vsub.f32 %v1051_v24, %v1525_v39  ;;  %v1103_v51 = vsub.f32 %v84_v34, %v1091_v45  ;;  %v1105_v52 = vand.u32 4294901760, %v82_v42  ;;  %v1109_v54 = vand.u32 4294901760, %v81_v47 }
  0x1f   :  { %103 = vmatpush.msra.mxu0 %v1020_v10  ;;  %299 = vmatpush.msra.mxu3 %v1020_v10  ;;  %v163_v55 = vand.u32 4294901760, %v162_v40  ;;  %v174_v56 = vsub.f32 %v1057_v28, %v1523_v41  ;;  %v1521_v57 = vand.u32 4294901760, %v1089_v44  ;;  %v1117_v58 = vsub.f32 %v83_v35, %v1093_v46  ;;  %v444_v41 = vld [vmem:[#allocation7 + $0x40] sm:$0xff] }
  0x20   :  { %146 = vmatpush.msra.mxu1 %v145_v37  ;;  %250 = vmatpush.msra.mxu2 %v1041_v19  ;;  %v180_v61 = vsub.f32 %v1072_v32, %v1522_v48  ;;  %v1124_v62 = vand.u32 4294901760, %v80_v53  ;;  %v169_v0 = vand.u32 4294901760, %v168_v50  ;;  %v1519_v1 = vand.u32 4294901760, %v1103_v51  ;;  %v448_v37 = vld [vmem:[#allocation7 + $0x60] sm:$0xff] }
  0x21   :  { %105 = vmatpush.msra.mxu0 %v1022_v11  ;;  %301 = vmatpush.msra.mxu3 %v1022_v11  ;;  %v1129_v2 = vsub.f32 %v82_v42, %v1105_v52  ;;  %v1134_v7 = vsub.f32 %v81_v47, %v1109_v54  ;;  %v1136_v8 = vand.u32 4294901760, %v79_v59  ;;  %v1138_v12 = vand.u32 4294901760, %v451_v60  ;;  %v447_v47 = vld [vmem:[#allocation7 + $0x58] sm:$0xff] }
  0x22   :  { %152 = vmatpush.msra.mxu1 %v151_v43  ;;  %253 = vmatpush.msra.mxu2 %v1051_v24  ;;  %v175_v25 = vand.u32 4294901760, %v174_v56  ;;  %v186_v29 = vsub.f32 %v1089_v44, %v1521_v57  ;;  %v1518_v30 = vand.u32 4294901760, %v1117_v58  ;;  %v1145_v31 = vand.u32 4294901760, %v450_v63 }
  0x23   :  { %107 = vmatpush.msra.mxu0 %v1035_v17  ;;  %303 = vmatpush.msra.mxu3 %v1035_v17  ;;  %1546 = vst [vmem:[#allocation15_spill] sm:$0xff] %v1136_v8  ;;  %v181_v34 = vand.u32 4294901760, %v180_v61  ;;  %v1150_v35 = vsub.f32 %v80_v53, %v1124_v62  ;;  %v1152_v36 = vand.u32 4294901760, %v78_v6  ;;  %v192_v38 = vsub.f32 %v1103_v51, %v1519_v1 }
  0x24   :  { %158 = vmatpush.msra.mxu1 %v157_v49  ;;  %256 = vmatpush.msra.mxu2 %v1057_v28  ;;  %v1520_v40 = vand.u32 4294901760, %v1129_v2  ;;  %v1160_v42 = vsub.f32 %v451_v60, %v1138_v12  ;;  %v1162_v43 = vand.u32 4294901760, %v449_v13  ;;  %v1524_v49 = vand.u32 4294901760, %v1134_v7 }
  0x25   :  { %109 = vmatpush.msra.mxu0 %v1043_v20  ;;  %305 = vmatpush.msra.mxu3 %v1043_v20  ;;  %1547 = vst [vmem:[#allocation16_spill] sm:$0xff] %v1152_v36  ;;  %v1168_v50 = vsub.f32 %v79_v59, %v1136_v8  ;;  %v187_v53 = vand.u32 4294901760, %v186_v29  ;;  %v1175_v56 = vsub.f32 %v450_v63, %v1145_v31  ;;  %v1177_v60 = vand.u32 4294901760, %v448_v37 }
  0x26   :  { %164 = vmatpush.msra.mxu1 %v163_v55  ;;  %259 = vmatpush.msra.mxu2 %v1072_v32  ;;  %1548 = vst [vmem:[#allocation17_spill] sm:$0xff] %v1160_v42  ;;  %v198_v55 = vsub.f32 %v1117_v58, %v1518_v30  ;;  %v1528_v59 = vand.u32 4294901760, %v1150_v35  ;;  %v1183_v61 = vsub.f32 %v78_v6, %v1152_v36  ;;  %v193_v29 = vand.u32 4294901760, %v192_v38  ;;  %v445_v38 = vld [vmem:[#allocation7 + $0x48] sm:$0xff] }
  0x27   :  { %111 = vmatpush.msra.mxu0 %v1074_v33  ;;  %307 = vmatpush.msra.mxu3 %v1074_v33  ;;  %1549 = vst [vmem:[#allocation18_spill] sm:$0xff] %v1175_v56  ;;  %v204_v63 = vsub.f32 %v1129_v2, %v1520_v40  ;;  %v1530_v30 = vand.u32 4294901760, %v1160_v42  ;;  %v1193_v1 = vsub.f32 %v449_v13, %v1162_v43  ;;  %v1534_v57 = vand.u32 4294901760, %v1175_v56 }
  0x28   :  { %170 = vmatpush.msra.mxu1 %v169_v0  ;;  %262 = vmatpush.msra.mxu2 %v1089_v44  ;;  %v1185_v0 = vand.u32 4294901760, %v447_v47  ;;  %v210_v6 = vsub.f32 %v1134_v7, %v1524_v49  ;;  %v199_v40 = vand.u32 4294901760, %v198_v55  ;;  %v1204_v13 = vsub.f32 %v448_v37, %v1177_v60 }
  0x29   :  { %113 = vmatpush.msra.mxu0 %v1091_v45  ;;  %309 = vmatpush.msra.mxu3 %v1091_v45  ;;  %1550 = vst [vmem:[#allocation19_spill] sm:$0xff] %v1193_v1  ;;  %v216_v49 = vsub.f32 %v1150_v35, %v1528_v59  ;;  %v205_v37 = vand.u32 4294901760, %v204_v63  ;;  %v497_v39 = vsub.f32 %v1160_v42, %v1530_v30  ;;  %v1536_v27 = vand.u32 4294901760, %v1193_v1  ;;  %v440_v42 = vld [vmem:[#allocation7 + $0x20] sm:$0xff] }
  0x2a   :  { %176 = vmatpush.msra.mxu1 %v175_v25  ;;  %265 = vmatpush.msra.mxu2 %v1103_v51  ;;  %v446_v25 = vld [vmem:[#allocation7 + $0x50] sm:$0xff]  ;;  %v1215_v55 = vsub.f32 %v447_v47, %v1185_v0  ;;  %v1222_v26 = vand.u32 4294901760, %v445_v38  ;;  %v211_v59 = vand.u32 4294901760, %v210_v6  ;;  %v1226_v23 = vand.u32 4294901760, %v444_v41  ;;  %v443_v47 = vld [vmem:[#allocation7 + $0x38] sm:$0xff] }
  0x2b   :  { %115 = vmatpush.msra.mxu0 %v1093_v46  ;;  %311 = vmatpush.msra.mxu3 %v1093_v46  ;;  %v1206_v48 = vand.u32 4294901760, %v446_v25  ;;  %v503_v63 = vsub.f32 %v1175_v56, %v1534_v57  ;;  %v217_v21 = vand.u32 4294901760, %v216_v49  ;;  %v498_v57 = vand.u32 4294901760, %v497_v39 }
  0x2c   :  { %182 = vmatpush.msra.mxu1 %v181_v34  ;;  %268 = vmatpush.msra.mxu2 %v1117_v58  ;;  %v1533_v34 = vand.u32 4294901760, %v1168_v50  ;;  %v1250_v30 = vsub.f32 %v445_v38, %v1222_v26  ;;  %v1252_v49 = vand.u32 4294901760, %v443_v47  ;;  %v1551_v38 = vand.u32 4294901760, %v1204_v13 }
  0x2d   :  { %117 = vmatpush.msra.mxu0 %v1105_v52  ;;  %313 = vmatpush.msra.mxu3 %v1105_v52  ;;  %v1237_v6 = vsub.f32 %v446_v25, %v1206_v48  ;;  %v509_v25 = vsub.f32 %v1193_v1, %v1536_v27  ;;  %v504_v27 = vand.u32 4294901760, %v503_v63 }
  0x2e   :  { %188 = vmatpush.msra.mxu1 %v187_v53  ;;  %271 = vmatpush.msra.mxu2 %v1129_v2  ;;  %v1535_v53 = vand.u32 4294901760, %v1183_v61  ;;  %v515_v1 = vsub.f32 %v1204_v13, %v1551_v38  ;;  %v1545_v63 = vand.u32 4294901760, %v1250_v30  ;;  %v1274_v38 = vsub.f32 %v443_v47, %v1252_v49 }
  0x2f   :  { %119 = vmatpush.msra.mxu0 %v1109_v54  ;;  %315 = vmatpush.msra.mxu3 %v1109_v54 }
  0x30   :  { %194 = vmatpush.msra.mxu1 %v193_v29  ;;  %274 = vmatpush.msra.mxu2 %v1134_v7  ;;  %v222_v29 = vsub.f32 %v1168_v50, %v1533_v34  ;;  %v441_v34 = vld [vmem:[#allocation7 + $0x28] sm:$0xff] }
  0x31   :  { %121 = vmatpush.msra.mxu0 %v1124_v62  ;;  %317 = vmatpush.msra.mxu3 %v1124_v62  ;;  %v1276_v56 = vand.u32 4294901760, %v441_v34 }
  0x32   :  { %200 = vmatpush.msra.mxu1 %v199_v40  ;;  %277 = vmatpush.msra.mxu2 %v1150_v35  ;;  %v228_v40 = vsub.f32 %v1183_v61, %v1535_v53  ;;  %v1257_v53 = vsub.f32 %v444_v41, %v1226_v23  ;;  %v223_v39 = vand.u32 4294901760, %v222_v29  ;;  %v510_v29 = vand.u32 4294901760, %v509_v25 }
  0x33   :  { %123 = vmatpush.msra.mxu0 %v1136_v8  ;;  %319 = vmatpush.msra.mxu3 %v1136_v8  ;;  %v1553_v8 = vand.u32 4294901760, %v1215_v55  ;;  %v1288_v25 = vand.u32 4294901760, %v440_v42 }
  0x34   :  { %206 = vmatpush.msra.mxu1 %v205_v37  ;;  %280 = vmatpush.msra.mxu2 %v1168_v50  ;;  %v1259_v37 = vand.u32 4294901760, %v442_v22  ;;  %v229_v41 = vand.u32 4294901760, %v228_v40  ;;  %v1555_v40 = vand.u32 4294901760, %v1237_v6 }
  0x35   :  { %125 = vmatpush.msra.mxu0 %v1152_v36  ;;  %321 = vmatpush.msra.mxu3 %v1152_v36  ;;  %v1552_v36 = vand.u32 4294901760, %v1025_v14  ;;  %v1554_v14 = vand.u32 4294901760, %v1029_v15  ;;  %v1556_v15 = vand.u32 4294901760, %v1033_v16  ;;  %v1557_v16 = vand.u32 4294901760, %v1257_v53 }
  0x36   :  { %212 = vmatpush.msra.mxu1 %v211_v59  ;;  %283 = vmatpush.msra.mxu2 %v1183_v61  ;;  %v521_v59 = vsub.f32 %v1215_v55, %v1553_v8  ;;  %v1283_v8 = vsub.f32 %v442_v22, %v1259_v37  ;;  %v527_v47 = vsub.f32 %v1237_v6, %v1555_v40 }
  0x37   :  { %332 = vmatpush.msrb.mxu0 %v1552_v36  ;;  %499 = vmatpush.msrb.mxu3 %v498_v57  ;;  %v516_v57 = vand.u32 4294901760, %v515_v1  ;;  %v438_v36 = vld [vmem:[#allocation7 + $0x10] sm:$0xff]  ;;  %v533_v22 = vsub.f32 %v1250_v30, %v1545_v63  ;;  %v1298_v1 = vsub.f32 %v441_v34, %v1276_v56  ;;  %v1311_v34 = vsub.f32 %v440_v42, %v1288_v25  ;;  %v77_v63 = vld [vmem:[#allocation5] sm:$0xff] }
  0x38   :  { %454 = vmatpush.msrb.mxu2 %v1138_v12  ;;  %218 = vmatpush.msra.mxu1 %v217_v21  ;;  %v439_v21 = vld [vmem:[#allocation7 + $0x18] sm:$0xff]  ;;  %v528_v40 = vand.u32 4294901760, %v527_v47  ;;  %v1560_v47 = vand.u32 4294901760, %v1283_v8 }
  0x39   :  { %336 = vmatpush.msrb.mxu0 %v1554_v14  ;;  %505 = vmatpush.msrb.mxu3 %v504_v27  ;;  %v522_v14 = vand.u32 4294901760, %v521_v59  ;;  %v544_v27 = vand.u32 4294901760, %v1274_v38  ;;  %v534_v59 = vand.u32 4294901760, %v533_v22  ;;  %v556_v42 = vand.u32 4294901760, %v1298_v1 }
  0x3a   :  { %456 = vmatpush.msrb.mxu2 %v1145_v31  ;;  %224 = vmatpush.msra.mxu1 %v223_v39  ;;  %v1300_v39 = vand.u32 4294901760, %v439_v21  ;;  %v562_v22 = vand.u32 4294901760, %v1311_v34 }
  0x3b   :  { %340 = vmatpush.msrb.mxu0 %v1556_v15  ;;  %511 = vmatpush.msrb.mxu3 %v510_v29  ;;  %v1558_v29 = vand.u32 4294901760, %v1038_v18  ;;  %v1313_v15 = vand.u32 4294901760, %v438_v36  ;;  %v545_v18 = vsub.f32 %v1274_v38, %v544_v27 }
  0x3c   :  { %458 = vmatpush.msrb.mxu2 %v1162_v43  ;;  %230 = vmatpush.msra.mxu1 %v229_v41  ;;  %v539_v41 = vsub.f32 %v1257_v53, %v1557_v16  ;;  %v1559_v16 = vand.u32 4294901760, %v1041_v19  ;;  %v551_v19 = vsub.f32 %v1283_v8, %v1560_v47 }
  0x3d   :  { %344 = vmatpush.msrb.mxu0 %v1558_v29  ;;  %517 = vmatpush.msrb.mxu3 %v516_v57  ;;  %v1324_v57 = vsub.f32 %v439_v21, %v1300_v39  ;;  %v1337_v21 = vsub.f32 %v438_v36, %v1313_v15 }
  0x3e   :  { %399 = vmatpush.msrb.mxu1 %v1012_v3  ;;  %460 = vmatpush.msrb.mxu2 %v1177_v60  ;;  %v437_v3 = vld [vmem:[#allocation7 + $0x8] sm:$0xff]  ;;  %v552_v36 = vand.u32 4294901760, %v551_v19 }
  0x3f   :  { %348 = vmatpush.msrb.mxu0 %v1559_v16  ;;  %523 = vmatpush.msrb.mxu3 %v522_v14  ;;  %v1561_v14 = vand.u32 4294901760, %v1051_v24  ;;  %v1334_v29 = vand.u32 4294901760, %v437_v3  ;;  %v1339_v16 = vand.u32 4294901760, %v77_v63  ;;  %v546_v24 = vand.u32 4294901760, %v545_v18 }
  0x40   :  { %401 = vmatpush.msrb.mxu1 %v1014_v4  ;;  %462 = vmatpush.msrb.mxu2 %v1185_v0  ;;  %v540_v4 = vand.u32 4294901760, %v539_v41  ;;  %v1562_v41 = vand.u32 4294901760, %v1057_v28  ;;  %v568_v47 = vand.u32 4294901760, %v1324_v57  ;;  %v563_v28 = vsub.f32 %v1311_v34, %v562_v22 }
  0x41   :  { %352 = vmatpush.msrb.mxu0 %v1561_v14  ;;  %529 = vmatpush.msrb.mxu3 %v528_v40  ;;  %v557_v40 = vsub.f32 %v1298_v1, %v556_v42  ;;  %v127_v18 = vsub.f32 %v77_v63, %v1339_v16 }
  0x42   :  { %403 = vmatpush.msrb.mxu1 %v1016_v5  ;;  %464 = vmatpush.msrb.mxu2 %v1206_v48  ;;  %v436_v5 = vld [vmem:[#allocation7] sm:$0xff] }
  0x43   :  { %356 = vmatpush.msrb.mxu0 %v1562_v41  ;;  %535 = vmatpush.msrb.mxu3 %v534_v59  ;;  %v1351_v14 = vand.u32 4294901760, %v436_v5  ;;  %v574_v59 = vand.u32 4294901760, %v1337_v21  ;;  %v1361_v41 = vsub.f32 %v437_v3, %v1334_v29  ;;  %v564_v3 = vand.u32 4294901760, %v563_v28 }
  0x44   :  { %405 = vmatpush.msrb.mxu1 %v1018_v9  ;;  %466 = vmatpush.msrb.mxu2 %v1222_v26  ;;  %v1563_v9 = vand.u32 4294901760, %v1072_v32  ;;  %v558_v32 = vand.u32 4294901760, %v557_v40  ;;  %v1567_v40 = vand.u32 4294901760, %v1129_v2  ;;  %v1569_v2 = vand.u32 4294901760, %v1150_v35  ;;  %v1571_v35 = vld [vmem:[#allocation17_spill] sm:$0xff] }
  0x45   :  { %541 = vmatpush.msrb.mxu3 %v540_v4  ;;  %v569_v4 = vsub.f32 %v1324_v57, %v568_v47  ;;  %v1373_v63 = vsub.f32 %v436_v5, %v1351_v14  ;;  %v580_v19 = vand.u32 4294901760, %v1361_v41  ;;  %286 = vmatmul.f32.vlgmr.msra.gmra.mxu2 %v127_v18 }
  0x46   :  { %407 = vmatpush.msrb.mxu1 %v1020_v10  ;;  %468 = vmatpush.msrb.mxu2 %v1226_v23  ;;  %v1564_v10 = vand.u32 4294901760, %v1089_v44  ;;  %v575_v44 = vsub.f32 %v1337_v21, %v574_v59 }
  0x47   :  { %360 = vmatpush.msrb.mxu0 %v1563_v9  ;;  %547 = vmatpush.msrb.mxu3 %v546_v24  ;;  %v128_v24 = vand.u32 4294901760, %v127_v18  ;;  %v570_v5 = vand.u32 4294901760, %v569_v4 }
  0x48   :  { %409 = vmatpush.msrb.mxu1 %v1022_v11  ;;  %470 = vmatpush.msrb.mxu2 %v1252_v49  ;;  %v1565_v11 = vand.u32 4294901760, %v1103_v51  ;;  %v586_v51 = vand.u32 4294901760, %v1373_v63 }
  0x49   :  { %364 = vmatpush.msrb.mxu0 %v1564_v10  ;;  %553 = vmatpush.msrb.mxu3 %v552_v36  ;;  %v576_v36 = vand.u32 4294901760, %v575_v44  ;;  %v129_v9 = vsub.f32 %v127_v18, %v128_v24  ;;  %v1572_v10 = vand.u32 4294901760, %v1571_v35  ;;  %v1574_v18 = vld [vmem:[#allocation15_spill] sm:$0xff]  ;;  %v1581_v44 = vand.u32 4294901760, %v1215_v55 }
  0x4a   :  { %411 = vmatpush.msrb.mxu1 %v1035_v17  ;;  %472 = vmatpush.msrb.mxu2 %v1259_v37  ;;  %v1566_v17 = vand.u32 4294901760, %v1117_v58  ;;  %v587_v58 = vsub.f32 %v1373_v63, %v586_v51 }
  0x4b   :  { %368 = vmatpush.msrb.mxu0 %v1565_v11  ;;  %559 = vmatpush.msrb.mxu3 %v558_v32 }
  0x4c   :  { %413 = vmatpush.msrb.mxu1 %v1043_v20  ;;  %474 = vmatpush.msrb.mxu2 %v1276_v56  ;;  %v581_v20 = vsub.f32 %v1361_v41, %v580_v19 }
  0x4d   :  { %372 = vmatpush.msrb.mxu0 %v1566_v17  ;;  %565 = vmatpush.msrb.mxu3 %v564_v3  ;;  %v1580_v3 = vand.u32 4294901760, %v1204_v13 }
  0x4e   :  { %415 = vmatpush.msrb.mxu1 %v1074_v33  ;;  %476 = vmatpush.msrb.mxu2 %v1288_v25  ;;  %v1568_v33 = vand.u32 4294901760, %v1134_v7  ;;  %v582_v28 = vand.u32 4294901760, %v581_v20  ;;  %v1570_v7 = vand.u32 4294901760, %v1168_v50  ;;  %v1575_v50 = vld [vmem:[#allocation18_spill] sm:$0xff] }
  0x4f   :  { %376 = vmatpush.msrb.mxu0 %v1567_v40  ;;  %571 = vmatpush.msrb.mxu3 %v570_v5  ;;  %v1576_v32 = vand.u32 4294901760, %v1575_v50 }
  0x50   :  { %417 = vmatpush.msrb.mxu1 %v1091_v45  ;;  %478 = vmatpush.msrb.mxu2 %v1300_v39  ;;  %v130_v45 = vand.u32 4294901760, %v129_v9 }
  0x51   :  { %380 = vmatpush.msrb.mxu0 %v1568_v33  ;;  %577 = vmatpush.msrb.mxu3 %v576_v36 }
  0x52   :  { %419 = vmatpush.msrb.mxu1 %v1093_v46  ;;  %480 = vmatpush.msrb.mxu2 %v1313_v15  ;;  %v588_v46 = vand.u32 4294901760, %v587_v58 }
  0x53   :  { %384 = vmatpush.msrb.mxu0 %v1569_v2  ;;  %583 = vmatpush.msrb.mxu3 %v582_v28 }
  0x54   :  { %421 = vmatpush.msrb.mxu1 %v1105_v52  ;;  %482 = vmatpush.msrb.mxu2 %v1334_v29  ;;  %v1573_v52 = vand.u32 4294901760, %v1183_v61  ;;  %v1578_v61 = vld [vmem:[#allocation19_spill] sm:$0xff] }
  0x55   :  { %388 = vmatpush.msrb.mxu0 %v1570_v7  ;;  %325 = vmatmul.f32.vlgmr.msra.gmra.mxu3 %v128_v24  ;;  %v1579_v4 = vand.u32 4294901760, %v1578_v61 }
  0x56   :  { %423 = vmatpush.msrb.mxu1 %v1109_v54  ;;  %484 = vmatpush.msrb.mxu2 %v1351_v14  ;;  %v1418_v54 = vld [vmem:[#allocation2] sm:$0xff] }
  0x57   :  { %131 = vmatmul.f32.vlgmr.msra.gmra.mxu0 %v130_v45  ;;  %589 = vmatpush.msrb.mxu3 %v588_v46  ;;  %v1429_v11 = vand.u32 4294901760, %v1418_v54 }
  0x58   :  { %425 = vmatpush.msrb.mxu1 %v1124_v62  ;;  %691 = vmatpush.msra.mxu2 %v1572_v10  ;;  %v1577_v62 = vld [vmem:[#allocation16_spill] sm:$0xff] }
  0x59   :  { %392 = vmatpush.msrb.mxu0 %v1573_v52  ;;  %232 = vmatmul.f32.vlgmr.msra.gmra.mxu1 %v1339_v16 }
  0x5a   :  { %427 = vmatpush.msrb.mxu1 %v1574_v18  ;;  %695 = vmatpush.msra.mxu2 %v1576_v32 }
  0x5b   :  { %597 = vmatpush.msra.mxu0 %v1571_v35  ;;  %758 = vmatpush.msra.mxu3 %v1138_v12 }
  0x5c   :  { %429 = vmatpush.msrb.mxu1 %v1577_v62  ;;  %699 = vmatpush.msra.mxu2 %v1579_v4 }
  0x5d   :  { %600 = vmatpush.msra.mxu0 %v1575_v50  ;;  %760 = vmatpush.msra.mxu3 %v1145_v31 }
  0x5e   :  { %650 = vmatpush.msra.mxu1 %v1138_v12  ;;  %703 = vmatpush.msra.mxu2 %v1580_v3  ;;  %v486_v12 = vsub.f32 %v1418_v54, %v1429_v11 }
  0x5f   :  { %603 = vmatpush.msra.mxu0 %v1578_v61  ;;  %762 = vmatpush.msra.mxu3 %v1162_v43 }
  0x60   :  { %652 = vmatpush.msra.mxu1 %v1145_v31  ;;  %394 = vmatmul.f32.vlgmr.msrb.gmra.mxu0 %v1339_v16  ;;  %v1582_v31 = vand.u32 4294901760, %v1237_v6 }
  0x61   :  { %606 = vmatpush.msra.mxu0 %v1204_v13  ;;  %707 = vmatpush.msra.mxu2 %v1581_v44  ;;  %v1583_v13 = vand.u32 4294901760, %v1250_v30 }
  0x62   :  { %654 = vmatpush.msra.mxu1 %v1162_v43  ;;  %764 = vmatpush.msra.mxu3 %v1177_v60  ;;  %v487_v43 = vand.u32 4294901760, %v486_v12 }
  0x63   :  { %431 = vmatmul.f32.vlgmr.msrb.gmra.mxu1 %v1339_v16  ;;  %609 = vmatpush.msra.mxu0 %v1215_v55 }
  0x64   :  { %656 = vmatpush.msra.mxu1 %v1177_v60  ;;  %711 = vmatpush.msra.mxu2 %v1582_v31  ;;  %v1584_v60 = vand.u32 4294901760, %v1257_v53  ;;  %v488_v55 = vsub.f32 %v486_v12, %v487_v43 }
  0x65   :  { %766 = vmatpush.msra.mxu3 %v1185_v0  ;;  %612 = vmatpush.msra.mxu0 %v1237_v6  ;;  %v452_v6 = vmul.f32 0.05, %v1418_v54 }
  0x66   :  { %658 = vmatpush.msra.mxu1 %v1185_v0  ;;  %715 = vmatpush.msra.mxu2 %v1583_v13 }
  0x67   :  { %768 = vmatpush.msra.mxu3 %v1206_v48  ;;  %615 = vmatpush.msra.mxu0 %v1250_v30  ;;  %v489_v30 = vand.u32 4294901760, %v488_v55 }
  0x68   :  { %660 = vmatpush.msra.mxu1 %v1206_v48  ;;  %719 = vmatpush.msra.mxu2 %v1584_v60  ;;  %v1585_v48 = vand.u32 4294901760, %v1283_v8 }
  0x69   :  { %770 = vmatpush.msra.mxu3 %v1222_v26  ;;  %618 = vmatpush.msra.mxu0 %v1257_v53 }
  0x6a   :  { %662 = vmatpush.msra.mxu1 %v1222_v26  ;;  %723 = vmatpush.msra.mxu2 %v544_v27 }
  0x6b   :  { %772 = vmatpush.msra.mxu3 %v1226_v23  ;;  %621 = vmatpush.msra.mxu0 %v1274_v38 }
  0x6c   :  { %664 = vmatpush.msra.mxu1 %v1226_v23  ;;  %727 = vmatpush.msra.mxu2 %v1585_v48 }
  0x6d   :  { %774 = vmatpush.msra.mxu3 %v1252_v49  ;;  %624 = vmatpush.msra.mxu0 %v1283_v8 }
  0x6e   :  { %666 = vmatpush.msra.mxu1 %v1252_v49  ;;  %731 = vmatpush.msra.mxu2 %v556_v42 }
  0x6f   :  { %776 = vmatpush.msra.mxu3 %v1259_v37  ;;  %627 = vmatpush.msra.mxu0 %v1298_v1 }
  0x70   :  { %668 = vmatpush.msra.mxu1 %v1259_v37  ;;  %735 = vmatpush.msra.mxu2 %v562_v22 }
  0x71   :  { %778 = vmatpush.msra.mxu3 %v1276_v56  ;;  %490 = vmatmul.f32.vlgmr.msrb.gmra.mxu2 %v489_v30 }
  0x72   :  { %630 = vmatpush.msra.mxu0 %v1311_v34  ;;  %670 = vmatpush.msra.mxu1 %v1276_v56 }
  0x73   :  { %739 = vmatpush.msra.mxu2 %v568_v47  ;;  %780 = vmatpush.msra.mxu3 %v1288_v25 }
  0x74   :  { %591 = vmatmul.f32.vlgmr.msrb.gmra.mxu3 %v1429_v11  ;;  %633 = vmatpush.msra.mxu0 %v1324_v57 }
  0x75   :  { %672 = vmatpush.msra.mxu1 %v1288_v25  ;;  %743 = vmatpush.msra.mxu2 %v574_v59 }
  0x76   :  { %782 = vmatpush.msra.mxu3 %v1300_v39  ;;  %636 = vmatpush.msra.mxu0 %v1337_v21 }
  0x77   :  { %674 = vmatpush.msra.mxu1 %v1300_v39  ;;  %747 = vmatpush.msra.mxu2 %v580_v19 }
  0x78   :  { %784 = vmatpush.msra.mxu3 %v1313_v15  ;;  %639 = vmatpush.msra.mxu0 %v1361_v41 }
  0x79   :  { %676 = vmatpush.msra.mxu1 %v1313_v15  ;;  %751 = vmatpush.msra.mxu2 %v586_v51 }
  0x7a   :  { %786 = vmatpush.msra.mxu3 %v1334_v29  ;;  %753 = vmatmul.f32.vlgmr.msra.gmra.mxu2 %v1429_v11 }
  0x7b   :  { %642 = vmatpush.msra.mxu0 %v1373_v63  ;;  %678 = vmatpush.msra.mxu1 %v1334_v29 }
  0x7c   :  { %788 = vmatpush.msra.mxu3 %v1351_v14  ;;  %645 = vmatmul.f32.vlgmr.msra.gmra.mxu0 %v486_v12 }
  0x7d   :  { %790 = vmatmul.f32.vlgmr.msra.gmra.mxu3 %v1429_v11  ;;  %680 = vmatpush.msra.mxu1 %v1351_v14 }
  0x7e   :  { %684 = vmatmul.f32.vlgmr.msra.gmra.mxu1 %v487_v43 }
  0xc8   :  { %v287_v56 = vpop.f32.mrf.mxu2 }
  0xd4   :  { %v132_v23 = vpop.f32.mrf.mxu0 }
  0xd6   :  { %v233_v26 = vpop.f32.mrf.mxu1 }
  0xd7   :  { %v234_v21 = vadd.f32 %v233_v26, %v132_v23 }
  0xd8   :  { %v326_v0 = vpop.f32.mrf.mxu3 }
  0xd9   :  { %v288_v16 = vadd.f32 %v287_v56, %v234_v21 }
  0xdb   :  { %v327_v14 = vadd.f32 %v326_v0, %v288_v16 }
  0xdd   :  { %v395_v53 = vpop.f32.mrf.mxu0 }
  0xde   :  { %v396_v19 = vadd.f32 %v395_v53, %v327_v14 }
  0xe0   :  { %v432_v49 = vpop.f32.mrf.mxu1 }
  0xe1   :  { %v433_v40 = vadd.f32 %v432_v49, %v396_v19 }
  0xf4   :  { %v491_v37 = vpop.f32.mrf.mxu2 }
  0xf5   :  { %v492_v38 = vadd.f32 %v491_v37, %v452_v6 }
  0xf7   :  { %v592_v8 = vpop.f32.mrf.mxu3 }
  0xf8   :  { %v593_v25 = vadd.f32 %v592_v8, %v492_v38 }
  0xf9   :  { %v646_v27 = vpop.f32.mrf.mxu0 }
  0xfa   :  { %v647_v1 = vadd.f32 %v646_v27, %v593_v25 }
  0xfb   :  { %v685_v39 = vpop.f32.mrf.mxu1 }
  0xfc   :  { %v686_v34 = vadd.f32 %v685_v39, %v647_v1 }
  0xfd   :  { %v754_v15 = vpop.f32.mrf.mxu2 }
  0xfe   :  { %v755_v42 = vadd.f32 %v754_v15, %v686_v34 }
 0x100   :  { %v791_v57 = vpop.f32.mrf.mxu3 }
 0x101   :  { %v792_v22 = vadd.f32 %v791_v57, %v755_v42 }
 0x103   :  { %v794_v29 = vadd.f32 0.10000012, %v792_v22 }
 0x105   :  { %838 = vrcp.f32 %v794_v29  ;;  %v806_v63 = vand.u32 2147483648, %v794_v29  ;;  %v804_v17 = vand.u32 2147483647, %v794_v29  ;;  %vm800_vm1 = vweird.f32 %v794_v29 }
 0x107   :  { %v807_v51 = vor.u32 1.1754944e-38, %v806_v63  ;;  %vm805_vm3 = vcmp.eq.f32.partialorder %v804_v17, 8.507059e+37 }
 0x10b   :  { %v839_v47 = vpop.eup %838 }
 0x10c   :  { %v796_v59 = vmul.f32 %v839_v47, %v794_v29  ;;  %vm801_vm0 = vweird.f32 %v839_v47 }
 0x10d   :  { %vm802_vm2 = vmor %vm800_vm1, %vm801_vm0 }
 0x10e   :  { %v797_v41 = vsub.f32 1.0, %v796_v59 }
 0x110   :  { %v798_v24 = vmul.f32 %v839_v47, %v797_v41 }
 0x112   :  { %v799_v5 = vadd.f32 %v839_v47, %v798_v24 }
 0x114   :  { %v803_v36 = vsel %vm802_vm2, %v839_v47, %v799_v5 }
 0x115   :  { %v808_v20 = vsel %vm805_vm3, %v807_v51, %v803_v36 }
 0x116   :  { %v809_v9 = vmul.f32 %v808_v20, %v433_v40 }
 0x118   :  { %v810_v33 = vmul.f32 %v809_v9, %v1418_v54 }
 0x11a   :  { %811 = vst [vmem:[#allocation10] sm:$0xff] %v810_v33 }
 0x11b   :  { %822 = dma.vmem_to_hbm [thread:$0]  %s818_s3, 128, %s820_s11, [#allocation4]  }
 0x11c   :  { %966 = dma.done.wait [#allocation4], 128  }
 0x11d   :  { %967 = vsyncadd [#allocation4], 4294967168 }
 0x11e   :  { %827 = vsyncpa [#allocation3], 1 }
 0x11f   :  { %828 = vsyncpa [#allocation6], 1 }
 0x120   :  { %829 = vsyncpa [#allocation9], 1 }
 0x121   :  { %830 = vsyncpa [#allocation4], 1 }

</bundles_post_ra>
